<compile_context>
chip_gen: v6e
topology: v6e:2x2x1
jax: 0.10.0
libtpu: 0.0.40
codegen_flags: <defaults>
</compile_context>

<pallas_src>
import functools

import numpy as np
import jax
import jax.numpy as jnp
from jax.experimental import pallas as pl
from jax.experimental.pallas import tpu as pltpu


def _round_up(x, m):
    return (x + m - 1) // m * m


def _smooth_kernel(main_ref, halo_ref, o_ref, *, taps):
    """main_ref: VMEM (TT, Dp)    input rows [i*TT, (i+1)*TT)
    halo_ref: VMEM (HALO, Dp)  input rows [(i+1)*TT, (i+1)*TT + HALO)
    o_ref:    VMEM (TT, Dp)    smoothed + L2-normalized output rows
    taps:     tuple of Python floats (compile-time constants), len == size.
    """
    tt = o_ref.shape[0]
    x = jnp.concatenate(
        [main_ref[...].astype(jnp.float32), halo_ref[...].astype(jnp.float32)],
        axis=0)                                    # (TT + HALO, Dp)
    # Valid cross-correlation over time (matches F.conv1d: no kernel flip).
    acc = taps[0] * x[0:tt, :]
    for k in range(1, len(taps)):
        acc = acc + taps[k] * x[k:k + tt, :]
    # _normalize: x / ||x||_2 with NO epsilon, exactly like the PyTorch module.
    inv = jax.lax.rsqrt(jnp.sum(acc * acc, axis=-1, keepdims=True))
    o_ref[...] = (acc * inv).astype(o_ref.dtype)


def gaussian_smoothing_over_time(x, size, sigma, *, time_tile=512):
    """x: (T, D) float32. Returns (T - size + 1, D), same dtype as x."""
    T, D = x.shape
    t_out = T - size + 1
    if t_out <= 0:
        raise ValueError("sequence shorter than the smoothing kernel")

    # Gaussian taps as compile-time constants (deterministic from size/sigma).
    grid_pts = np.arange(size, dtype=np.float32) - (size // 2)
    g = np.exp(-(grid_pts ** 2) / (2.0 * sigma ** 2))
    taps = tuple(float(v) for v in (g / g.sum()).astype(np.float32))

    halo = _round_up(max(size - 1, 1), 8)      # sublane-aligned halo rows
    dp = _round_up(D, 128)                     # lane-dense feature width

    # Time tile: multiple of `halo` (hence of 8), large enough to amortize the
    # ~0.35us/step overhead, small enough that double-buffered in/out tiles
    # plus in-kernel temporaries stay well under the smallest scoped-VMEM
    # budget of v5e/v6e/v7x.
    vmem_budget = 12 * 1024 * 1024
    tt_cap = max(halo, (vmem_budget // (6 * 4 * dp)) // halo * halo)
    tt = min(_round_up(t_out, halo), _round_up(time_tile, halo), tt_cap)
    n_tiles = pl.cdiv(t_out, tt)

    # Zero-pad time so the last main tile and its halo are in-bounds, and pad
    # features to the lane-dense width. Zero lanes never affect the norm; the
    # few padded tail rows are sliced off below.
    t_pad = n_tiles * tt + halo
    x_p = jnp.pad(x, ((0, t_pad - T), (0, dp - D)))

    hb = tt // halo  # halo-sized blocks per time tile

    out_padded = pl.pallas_call(
        functools.partial(_smooth_kernel, taps=taps),
        out_shape=jax.ShapeDtypeStruct((n_tiles * tt, dp), x.dtype),
        grid=(n_tiles,),
        in_specs=[
            pl.BlockSpec((tt, dp), lambda i: (i, 0)),            # main tile
            pl.BlockSpec((halo, dp), lambda i: ((i + 1) * hb, 0)),  # halo rows
        ],
        out_specs=pl.BlockSpec((tt, dp), lambda i: (i, 0)),
        compiler_params=pltpu.CompilerParams(
            dimension_semantics=("parallel",),          # megacore on v7x
            vmem_limit_bytes=32 * 1024 * 1024,
        ),
    )(x_p, x_p)

    # Drop padded tail rows (their inputs are zero padding -> discarded) and
    # padded lanes.
    return out_padded[:t_out, :D]


def _reference(x, size, sigma):
    grid_pts = jnp.arange(size, dtype=jnp.float32) - (size // 2)
    g = jnp.exp(-(grid_pts ** 2) / (2.0 * sigma ** 2))
    kern = g / jnp.sum(g)
    t_out = x.shape[0] - size + 1
    y = sum(kern[k] * x[k:k + t_out, :] for k in range(size))
    return y / jnp.linalg.norm(y, axis=-1, keepdims=True)


if __name__ == "__main__":
    SIZE, SIGMA = 5, 1.0

    # Config 1: multiple time tiles (grid of 3) + non-128 feature width,
    # exercising the halo across tile boundaries and the lane padding path.
    T1, D1 = 48, 96
    x1 = jax.random.normal(jax.random.PRNGKey(0), (T1, D1), dtype=jnp.float32)
    out1 = jax.block_until_ready(
        gaussian_smoothing_over_time(x1, SIZE, SIGMA, time_tile=16))
    ref1 = _reference(x1, SIZE, SIGMA)
    assert out1.shape == (T1 - SIZE + 1, D1)
    assert jnp.allclose(out1, ref1, atol=1e-5, rtol=1e-5)

    # Config 2: original toy shape, single-tile path with default tile size.
    T2, D2 = 16, 32
    x2 = jax.random.normal(jax.random.PRNGKey(1), (T2, D2), dtype=jnp.float32)
    out2 = jax.block_until_ready(gaussian_smoothing_over_time(x2, SIZE, SIGMA))
    ref2 = _reference(x2, SIZE, SIGMA)
    assert out2.shape == (T2 - SIZE + 1, D2)
    assert jnp.allclose(out2, ref2, atol=1e-5, rtol=1e-5)

    print("KERNEL_OK")
</pallas_src>

<mosaic_0001>
module attributes {stable_mosaic.version = 11 : i64} {
  func.func @_smooth_kernel(%arg0: i32, %arg1: memref<16x128xf32, #tpu.memory_space<vmem>>, %arg2: memref<8x128xf32, #tpu.memory_space<vmem>>, %arg3: memref<16x128xf32, #tpu.memory_space<vmem>>) attributes {dimension_semantics = [#tpu.dimension_semantics<parallel>], iteration_bounds = array<i64: 3>, scalar_prefetch = 0 : i64, scratch_operands = 0 : i64, tpu.core_type = #tpu.core_type<tc>, window_params = [{transform_indices = @transform_0, window_bounds = array<i64: 16, 128>}, {transform_indices = @transform_1, window_bounds = array<i64: 8, 128>}, {transform_indices = @transform_2, window_bounds = array<i64: 16, 128>}]} {
    %c0 = arith.constant 0 : index
    %c0_0 = arith.constant 0 : index
    %0 = vector.load %arg1[%c0, %c0_0] : memref<16x128xf32, #tpu.memory_space<vmem>>, vector<16x128xf32>
    %c0_1 = arith.constant 0 : index
    %c0_2 = arith.constant 0 : index
    %1 = vector.load %arg2[%c0_1, %c0_2] : memref<8x128xf32, #tpu.memory_space<vmem>>, vector<8x128xf32>
    %2 = tpu.concatenate %0, %1 in 0 : vector<16x128xf32>, vector<8x128xf32> -> vector<24x128xf32>
    %3 = vector.extract_strided_slice %2 {offsets = [0, 0], sizes = [16, 128], strides = [1, 1]} : vector<24x128xf32> to vector<16x128xf32>
    %cst = arith.constant 0.0544886887 : f32
    %4 = vector.broadcast %cst : f32 to vector<16x128xf32>
    %5 = arith.mulf %4, %3 : vector<16x128xf32>
    %6 = vector.extract_strided_slice %2 {offsets = [1, 0], sizes = [16, 128], strides = [1, 1]} : vector<24x128xf32> to vector<16x128xf32>
    %cst_3 = arith.constant 0.244201362 : f32
    %7 = vector.broadcast %cst_3 : f32 to vector<16x128xf32>
    %8 = arith.mulf %7, %6 : vector<16x128xf32>
    %9 = arith.addf %5, %8 : vector<16x128xf32>
    %10 = vector.extract_strided_slice %2 {offsets = [2, 0], sizes = [16, 128], strides = [1, 1]} : vector<24x128xf32> to vector<16x128xf32>
    %cst_4 = arith.constant 0.402619958 : f32
    %11 = vector.broadcast %cst_4 : f32 to vector<16x128xf32>
    %12 = arith.mulf %11, %10 : vector<16x128xf32>
    %13 = arith.addf %9, %12 : vector<16x128xf32>
    %14 = vector.extract_strided_slice %2 {offsets = [3, 0], sizes = [16, 128], strides = [1, 1]} : vector<24x128xf32> to vector<16x128xf32>
    %cst_5 = arith.constant 0.244201362 : f32
    %15 = vector.broadcast %cst_5 : f32 to vector<16x128xf32>
    %16 = arith.mulf %15, %14 : vector<16x128xf32>
    %17 = arith.addf %13, %16 : vector<16x128xf32>
    %18 = vector.extract_strided_slice %2 {offsets = [4, 0], sizes = [16, 128], strides = [1, 1]} : vector<24x128xf32> to vector<16x128xf32>
    %cst_6 = arith.constant 0.0544886887 : f32
    %19 = vector.broadcast %cst_6 : f32 to vector<16x128xf32>
    %20 = arith.mulf %19, %18 : vector<16x128xf32>
    %21 = arith.addf %17, %20 : vector<16x128xf32>
    %22 = arith.mulf %21, %21 : vector<16x128xf32>
    %cst_7 = arith.constant dense<0.000000e+00> : vector<16xf32>
    %23 = vector.multi_reduction <add>, %22, %cst_7 [1] : vector<16x128xf32> to vector<16xf32>
    %24 = vector.shape_cast %23 : vector<16xf32> to vector<16x1xf32>
    %25 = math.rsqrt %24 : vector<16x1xf32>
    %26 = vector.broadcast %25 : vector<16x1xf32> to vector<16x128xf32>
    %27 = arith.mulf %21, %26 : vector<16x128xf32>
    %c0_8 = arith.constant 0 : index
    %c0_9 = arith.constant 0 : index
    %28 = vector.load %arg3[%c0_8, %c0_9] : memref<16x128xf32, #tpu.memory_space<vmem>>, vector<16x128xf32>
    tpu.vector_store %arg3[%c0_8, %c0_9], %27 {strides = array<i32>} : memref<16x128xf32, #tpu.memory_space<vmem>>, vector<16x128xf32>,
    return
  }
  func.func @transform_0(%arg0: i32) -> (i32, i32) {
    %c0_i32 = arith.constant 0 : i32
    %c0_i32_0 = arith.constant 0 : i32
    return %arg0, %c0_i32 : i32, i32
  }
  func.func @transform_1(%arg0: i32) -> (i32, i32) {
    %c1_i32 = arith.constant 1 : i32
    %0 = arith.addi %arg0, %c1_i32 : i32
    %c2_i32 = arith.constant 2 : i32
    %1 = arith.muli %0, %c2_i32 : i32
    %c0_i32 = arith.constant 0 : i32
    %c0_i32_0 = arith.constant 0 : i32
    return %1, %c0_i32 : i32, i32
  }
  func.func @transform_2(%arg0: i32) -> (i32, i32) {
    %c0_i32 = arith.constant 0 : i32
    %c0_i32_0 = arith.constant 0 : i32
    return %arg0, %c0_i32 : i32, i32
  }
}

</mosaic_0001>

<bundles_post_ra>
// kernel: tpu_custom_call.1
= control target key start
LH: loop header
LB: loop body
LE: loop exit
PB: predicated region body
PF: predicated region fallthrough
CT: control target
= control target key end

     0   :  { %s932_s0 = inlined_call_operand.hbm [shape: f32[56,128], index: 0, kind: input, shape index: {}]   ;;  %s933_s1 = inlined_call_operand.hbm [shape: f32[56,128], index: 1, kind: input, shape index: {}]   ;;  %s934_s2 = inlined_call_operand.hbm [shape: f32[48,128], index: 2, kind: output, shape index: {}]  }
   0x1   :  { %938 = sst [smem:[#allocation13_spill]] %s932_s0 }
   0x2   :  { %7 = vsyncpa [#allocation3], 0 }
   0x3   :  { %9 = vsyncpa [#allocation3 + $0x1], 0 }
   0x4   :  { %10 = vsyncpa [#allocation6], 0 }
   0x5   :  { %12 = vsyncpa [#allocation6 + $0x1], 0 }
   0x6   :  { %13 = vsyncpa [#allocation4], 0 }
   0x7   :  { %15 = vsyncpa [#allocation4 + $0x1], 0  ;;  %s677_s9 = smov 0   ;;  %s679_s10 = smov 0  }
   0x8   :  { %s681_s11 = smov 0   ;;  %s683_s12 = smov 0  }
   0x9   :  { %s685_s13 = smov 0   ;;  %s687_s14 = smov 0  }
   0xa   :  { %s689_s15 = smov 0  }
   0xb LB: > { %939 = sst [smem:[#allocation11_spill]] %s649_s14  ;;  %s711_s16 = sadd.s32 4294967295, %s653_s15   ;;  %s653_s15 = sphi %s689_s15, %s958_s15   ;;  %s649_s14 = sphi %s687_s14, %s952_s14   ;;  %s645_s13 = sphi %s685_s13, %s957_s13   ;;  %s641_s12 = sphi %s683_s12, %s956_s12   ;;  %s637_s11 = sphi %s681_s11, %s955_s11   ;;  %s633_s10 = sphi %s679_s10, %s954_s10   ;;  %s629_s9 = sphi %s677_s9, %s953_s9  }
   0xc   : > { %s403_s17 = sadd.s32 4294967294, %s653_s15   ;;  %s715_s18 = sadd.s32 1, %s653_s15  }
   0xd   : > { %s28_s19 = sadd.s32 1, %s649_s14  ;;  %s25_s20 = ssub.s32 %s653_s15, %s715_s18 }
   0xe   : > { %p35_p0 = scmp.ne.s32.totalorder %s649_s14, %s645_s13  ;;  %p26_p1 = scmp.eq.s32.totalorder %s25_s20, 0 }
   0xf   : > { %p36_p2 = scmp.eq.s32.totalorder %s653_s15, 0  ;;  %p41_p3 = scmp.ne.s32.totalorder %s645_s13, %s641_s12 }
  0x10   : > { %p42_p4 = scmp.eq.s32.totalorder %s711_s16, 0  ;;  %s426_s24 = sshll.u32 %s653_s15, 1 }
  0x11   : > { %s727_s21 = scalar_select %p26_p1, %s649_s14, %s28_s19  }
  0x12   : > { %p734_p5 = por %p36_p2, %p35_p0  ;;  %p743_p6 = por %p42_p4, %p41_p3 }
  0x13   : > { %940 = sst [smem:[#allocation12_spill]] %s727_s21  ;;  %s58_s25 = sadd.s32 1, %s637_s11 }
  0x14   : > { %s427_s26 = sadd.s32 2, %s426_s24  ;;  %p65_p7 = scmp.ne.s32.totalorder %s637_s11, %s633_s10 }
  0x15   : > { %s429_s27 = sadd.s32 2, %s427_s26  ;;  %p71_p8 = scmp.ne.s32.totalorder %s633_s10, %s629_s9 }
  0x16   : > { %s55_s28 = ssub.s32 %s427_s26, %s429_s27  ;;  %p754_p9 = por %p65_p7, %p36_p2 }
  0x17   : > { %p56_p10 = scmp.eq.s32.totalorder %s55_s28, 0  ;;  %p760_p11 = por %p71_p8, %p42_p4 }
  0x18   : > { %p95_p12 = scmp.eq.s32.totalorder %s711_s16, 2  ;;  %p101_p13 = scmp.eq.s32.totalorder %s403_s17, 2 }
  0x19   : > { %s944_s30 = scalar_select %p760_p11, 1, 0 }
  0x1a   : > { %s766_s3 = scalar_select %p56_p10, %s637_s11, %s58_s25  }
  0x1b   : > { %p771_p1 = por %p95_p12, %p35_p0  ;;  %p778_p2 = por %p101_p13, %p41_p3 }
  0x1c   : > { %p407_p7 = scmp.ge.s32.totalorder %s653_s15, 3 }
  0x1d   : > { %s945_s4 = scalar_select %p771_p1, 1, 0 }
  0x1e   : > { %s946_s5 = scalar_select %p778_p2, 1, 0 }
  0x1f   : > { %117 = sbr.rel (%p407_p7) target bundleno = 99 (0x63), region = 16 }
  0x24   : > { %120 = sbr.rel (!%p734_p5) target bundleno = 74 (0x4a), region = 20  ;;  %s121_s6 = sand.u32 (%p734_p5), 1, %s649_s14  }
  0x25   : > { %s127_s7 = ssub.s32 (%p734_p5), 7, %s426_s24  ;;  %s408_s8 = sshll.u32 (%p734_p5), %s121_s6, 4 }
  0x26   : > { %p128_p4 = scmp.lt.s32.totalorder (%p734_p5), %s127_s7, 2  ;;  %s789_s19 = scalar_lea.sflag (%p734_p5), [#allocation3], %s121_s6 }
  0x27   : > { %s125_s20 = scalar_lea.vmem (%p734_p5), [#allocation2], %s408_s8 }
  0x29   : > { %s960_s7 = smov (!%p128_p4, %s127_s7), 2 }
  0x2a   : > { %s786_s9 = sshll.u32 %s960_s7, 7 }
  0x2b   : > { %s132_s17 = ssub.s32 256, %s786_s9 }
  0x2c   : > { %133 = vsyncadd %s789_s19, %s132_s17  ;;  %p411_p0 = scmp.ne.s32.totalorder %s786_s9, 0  ;;  %s430_s22 = sshll.u32 %s653_s15, 8 }
  0x2d   : > { %s947_s0 = sld [smem:[#allocation13_spill]]  ;;  %s138_s27 = sshll.u32 %s125_s20, 4  ;;  %s799_s27 = int_to_ptr.vmem [resolvable:$true] %s138_s27 }
  0x33   : > { %s797_s26 = scalar_lea.hbm %s947_s0, %s430_s22  ;;  %s512_s8 = scalar_lea.hbm %s947_s0, 896 }
  0x34   : > { %s508_s28 = scalar_lea.hbm %s797_s26, %s786_s9  ;;  %p513_p10 = scmp.lt.s32.totalorder %s797_s26, %s947_s0 }
  0x35   : > { %p509_p3 = scmp.ne.s32.totalorder %s797_s26, %s508_s28  ;;  %p514_p12 = scmp.lt.s32.totalorder %s512_s8, %s508_s28 }
  0x37   : > { %p510_p5 = pnand %p509_p3, %p411_p0  ;;  %p515_p13 = por %p514_p12, %p513_p10 }
  0x39   : > { %p511_p8 = pneg %p510_p5 }
  0x3b   : > { %p516_p7 = pnand %p515_p13, %p511_p8 }
  0x3d   : > { %519 = shalt.err (!%p516_p7)
}
  0x3e   : > { %s520_s20 = scalar_lea.vmem %s799_s27, %s786_s9  ;;  %s655_s22 = smov [#allocation2]  }
  0x3f   : > { %p521_p4 = scmp.ne.s32.totalorder %s799_s27, %s520_s20  ;;  %s524_s25 = sshll.u32 %s655_s22, 4  ;;  %s525_s25 = int_to_ptr.vmem [resolvable:$false] %s524_s25 }
  0x40   : > { %s526_s24 = scalar_lea.vmem %s525_s25, 512  ;;  %p527_p2 = scmp.lt.s32.totalorder %s799_s27, %s525_s25 }
  0x41   : > { %p522_p3 = pnand %p521_p4, %p411_p0  ;;  %p528_p1 = scmp.lt.s32.totalorder %s526_s24, %s520_s20 }
  0x43   : > { %p523_p5 = pneg %p522_p3  ;;  %p529_p11 = por %p528_p1, %p527_p2 }
  0x45   : > { %p530_p10 = pnand %p529_p11, %p523_p5 }
  0x47   : > { %533 = shalt.err (!%p530_p10)
}
  0x48   : > { %s656_s21 = smov 128   ;;  %s657_s28 = smov 8  }
  0x49   : > { %144 = dma.hbm_to_vmem [thread:$0]  (%p411_p0), %s797_s26, %s786_s9, %s799_s27, %s789_s19, %s656_s21, %s656_s21, %s657_s28  }
  0x4a PF: > { %s148_s6 = sand.u32 1, %s637_s11   ;;  %s416_s7 = sshll.u32 %s653_s15, 8 }
  0x4b   : > { %s415_s8 = sshll.u32 %s148_s6, 3  ;;  %s345_s22 = scalar_lea.hbm %s933_s1, %s416_s7 }
  0x4c   : > { %s830_s25 = scalar_lea.hbm %s345_s22, 256  ;;  %s152_s24 = scalar_lea.vmem [#allocation5], %s415_s8 }
  0x4d   : > { %s161_s0 = sshll.u32 %s152_s24, 4  ;;  %s149_s14 = scalar_lea.sflag [#allocation6], %s148_s6  ;;  %s162_s0 = int_to_ptr.vmem [resolvable:$true] %s161_s0 }
  0x4e   : > { %s560_s9 = scalar_lea.hbm %s345_s22, 384  ;;  %s538_s27 = scalar_lea.hbm %s933_s1, 896 }
  0x4f   : > { %p535_p11 = scmp.ne.s32.totalorder %s830_s25, %s560_s9  ;;  %p539_p0 = scmp.lt.s32.totalorder %s830_s25, %s933_s1 }
  0x50   : > { %p540_p8 = scmp.lt.s32.totalorder %s538_s27, %s560_s9 }
  0x51   : > { %p536_p1 = pnand %p535_p11, %p754_p9 }
  0x52   : > { %p541_p12 = por %p540_p8, %p539_p0 }
  0x53   : > { %p537_p2 = pneg %p536_p1 }
  0x55   : > { %p542_p13 = pnand %p541_p12, %p537_p2 }
  0x57   : > { %545 = shalt.err (!%p542_p13)
}
  0x58   : > { %s546_s7 = scalar_lea.vmem %s162_s0, 128  ;;  %s658_s6 = smov [#allocation5]  }
  0x59   : > { %p547_p7 = scmp.ne.s32.totalorder %s162_s0, %s546_s7  ;;  %s550_s8 = sshll.u32 %s658_s6, 4  ;;  %s551_s8 = int_to_ptr.vmem [resolvable:$false] %s550_s8 }
  0x5a   : > { %s552_s17 = scalar_lea.vmem %s551_s8, 256  ;;  %p553_p5 = scmp.lt.s32.totalorder %s162_s0, %s551_s8 }
  0x5b   : > { %p548_p4 = pnand %p547_p7, %p754_p9  ;;  %p554_p10 = scmp.lt.s32.totalorder %s552_s17, %s546_s7 }
  0x5d   : > { %p549_p3 = pneg %p548_p4  ;;  %p555_p11 = por %p554_p10, %p553_p5 }
  0x5f   : > { %p556_p1 = pnand %p555_p11, %p549_p3 }
  0x61   : > { %559 = shalt.err (!%p556_p1)
}
  0x62   : > { %434 = dma.hbm_to_vmem [thread:$0]  (%p754_p9), %s830_s25, 128, %s162_s0, %s149_s14  }
  0x63 PF: > { %p417_p2 = scmp.ge.s32.totalorder %s653_s15, 1  ;;  %p166_p0 = scmp.lt.s32.totalorder %s653_s15, 4 }
  0x65   : > { %p167_p8 = pnand %p417_p2, %p166_p0 }
  0x66   : > { %s850_s20 = sand.u32 (!%p167_p8), 1, %s645_s13  }
  0x67   : > { %170 = sbr.rel (%p167_p8) target bundleno = 302 (0x12e), region = 28  ;;  %s418_s22 = sshll.u32 (!%p167_p8), %s850_s20, 4 }
  0x68   : > { %s173_s24 = scalar_lea.sflag (!%p167_p8), [#allocation3], %s850_s20  ;;  %s176_s29 = scalar_lea.vmem (!%p167_p8), [#allocation2], %s418_s22 }
  0x6c   : > { %616 = dma.done.wait (%p743_p6), %s173_s24, 256  }
  0x6d   : > { %618 = vsyncadd (%p743_p6), %s173_s24, 4294967040  ;;  %s181_s0 = sand.u32 1, %s633_s10   ;;  %p948_p9 = scmp.ne.s32.totalorder %s944_s30, 0 }
  0x6e   : > { %s419_s14 = sshll.u32 %s181_s0, 3  ;;  %s182_s25 = scalar_lea.sflag [#allocation6], %s181_s0 }
  0x6f   : > { %s185_s9 = scalar_lea.vmem [#allocation5], %s419_s14 }
  0x70   : > { %620 = dma.done.wait (%p948_p9), %s182_s25, 128  }
  0x71   : > { %622 = vsyncadd (%p948_p9), %s182_s25, 4294967168  ;;  %v219_v0 = vld [vmem:[%s176_s29] sm:$0xff]  ;;  %v220_v1 = vld [vmem:[%s176_s29 + $0x8] sm:$0xff]  ;;  %vm230_vm0 = vcmask 1046528   ;;  %vm246_vm1 = vcmask 1045504   ;;  %vm256_vm2 = vcmask 1044480  }
  0x72   : > { %v223_v2 = vmul.f32 0.05448869, %v220_v1  ;;  %v224_v3 = vmul.f32 0.24420136, %v219_v0  ;;  %v221_v4 = vld [vmem:[%s185_s9] sm:$0xff]  ;;  %vm270_vm3 = vcmask 1043456  }
  0x73   : > { %v225_v5 = vmul.f32 0.24420136, %v220_v1  ;;  %v240_v6 = vmul.f32 0.40261996, %v219_v0  ;;  %v241_v7 = vmul.f32 0.40261996, %v220_v1 }
  0x74   : > { %v222_v8 = vmul.f32 0.05448869, %v219_v0  ;;  %v231_v9 = vrot.slane %v224_v3, 1  ;;  %v257_v10 = vrot.slane %v224_v3, 3  ;;  %v226_v15 = vmul.f32 0.24420136, %v221_v4 }
  0x75   : > { %v232_v11 = vrot.slane %v225_v5, 1  ;;  %v247_v12 = vrot.slane %v240_v6, 2  ;;  %v248_v13 = vrot.slane %v241_v7, 2  ;;  %v258_v14 = vrot.slane %v225_v5, 3  ;;  %s431_s23 = sshll.u32 %s711_s16, 8  ;;  %s210_s30 = scalar_lea.vmem [#allocation7], %s418_s22 }
  0x76   : > { %v242_v16 = vmul.f32 0.40261996, %v221_v4  ;;  %v266_v17 = vmul.f32 0.05448869, %v221_v4  ;;  %v271_v20 = vrot.slane %v222_v8, 4  ;;  %v272_v21 = vrot.slane %v223_v2, 4  ;;  %s879_s21 = scalar_lea.hbm %s934_s2, %s431_s23 }
  0x77   : > { %v233_v18 = vsel %vm230_vm0, %v231_v9, %v232_v11  ;;  %v249_v19 = vsel %vm246_vm1, %v247_v12, %v248_v13  ;;  %v234_v23 = vrot.slane %v226_v15, 1  ;;  %v260_v25 = vrot.slane %v226_v15, 3  ;;  %s306_s19 = sshll.u32 %s210_s30, 4  ;;  %s293_s28 = scalar_lea.sflag [#allocation4], %s850_s20  ;;  %s881_s19 = int_to_ptr.vmem [resolvable:$true] %s306_s19 }
  0x78   : > { %v238_v22 = vadd.f32 %v233_v18, %v222_v8  ;;  %v250_v24 = vrot.slane %v242_v16, 2  ;;  %v259_v26 = vsel %vm256_vm2, %v257_v10, %v258_v14  ;;  %v274_v30 = vrot.slane %v266_v17, 4  ;;  %s561_s7 = scalar_lea.vmem %s881_s19, 256  ;;  %p949_p12 = scmp.ne.s32.totalorder %s945_s4, 0 }
  0x79   : > { %v235_v28 = vsel %vm230_vm0, %v232_v11, %v234_v23  ;;  %v273_v31 = vsel %vm270_vm3, %v271_v20, %v272_v21  ;;  %v261_v34 = vsel %vm256_vm2, %v258_v14, %v260_v25  ;;  %p562_p6 = scmp.ne.s32.totalorder %s881_s19, %s561_s7  ;;  %s659_s16 = smov [#allocation7]  }
  0x7a   : > { %v254_v27 = vadd.f32 %v249_v19, %v238_v22  ;;  %v251_v29 = vsel %vm246_vm1, %v248_v13, %v250_v24  ;;  %v239_v32 = vadd.f32 %v235_v28, %v223_v2  ;;  %v275_v37 = vsel %vm270_vm3, %v272_v21, %v274_v30  ;;  %s565_s6 = sshll.u32 %s659_s16, 4  ;;  %s566_s6 = int_to_ptr.vmem [resolvable:$false] %s565_s6 }
  0x7b   : > { %p563_p13 = pnand %p562_p6, %p949_p12  ;;  %s567_s8 = scalar_lea.vmem %s566_s6, 512 }
  0x7c   : > { %v264_v33 = vadd.f32 %v259_v26, %v254_v27  ;;  %v255_v35 = vadd.f32 %v251_v29, %v239_v32  ;;  %p568_p4 = scmp.lt.s32.totalorder %s881_s19, %s566_s6  ;;  %p569_p3 = scmp.lt.s32.totalorder %s567_s8, %s561_s7 }
  0x7d   : > { %p564_p7 = pneg %p563_p13 }
  0x7e   : > { %v278_v36 = vadd.f32 %v273_v31, %v264_v33  ;;  %v265_v38 = vadd.f32 %v261_v34, %v255_v35  ;;  %p570_p5 = por %p569_p3, %p568_p4 }
  0x80   : > { %v280_v39 = vmul.f32 %v278_v36, %v278_v36  ;;  %v279_v40 = vadd.f32 %v275_v37, %v265_v38  ;;  %p571_p10 = pnand %p570_p5, %p564_p7 }
  0x82   : > { %282 = vadd.xlane.f32.xlu0 %v280_v39  ;;  %v281_v41 = vmul.f32 %v279_v40, %v279_v40 }
  0x86   : > { %284 = vadd.xlane.f32.xlu0 %v281_v41 }
 0x10b   : > { %v283_v42 = vpop.xlane.xlu0 %282 }
 0x10c   : > { %504 = vrsqrt.f32 %v283_v42 }
 0x10f   : > { %v285_v43 = vpop.xlane.xlu0 %284 }
 0x110   : > { %506 = vrsqrt.f32 %v285_v43 }
 0x119   : > { %v505_v44 = vpop.eup %504 }
 0x11a   : > { %v288_v45 = vmul.f32 %v505_v44, %v278_v36 }
 0x11c   : > { %290 = vst [vmem:[%s210_s30] sm:$0xff] %v288_v45 }
 0x11d   : > { %v507_v46 = vpop.eup %506 }
 0x11e   : > { %v289_v47 = vmul.f32 %v507_v46, %v279_v40 }
 0x120   : > { %291 = vst [vmem:[%s210_s30 + $0x8] sm:$0xff] %v289_v47 }
 0x121   : > { %574 = shalt.err (!%p571_p10)
}
 0x122   : > { %s575_s17 = scalar_lea.hbm %s879_s21, 256  ;;  %s579_s29 = scalar_lea.hbm %s934_s2, 768 }
 0x123   : > { %p576_p11 = scmp.ne.s32.totalorder %s879_s21, %s575_s17  ;;  %p580_p0 = scmp.lt.s32.totalorder %s879_s21, %s934_s2 }
 0x124   : > { %p581_p8 = scmp.lt.s32.totalorder %s579_s29, %s575_s17 }
 0x125   : > { %p577_p1 = pnand %p576_p11, %p949_p12 }
 0x126   : > { %p582_p9 = por %p581_p8, %p580_p0 }
 0x127   : > { %p578_p2 = pneg %p577_p1 }
 0x129   : > { %p583_p6 = pnand %p582_p9, %p578_p2 }
 0x12b   : > { %586 = shalt.err (!%p583_p6)
}
 0x12c   : > { %s660_s25 = smov 128   ;;  %s661_s9 = smov 8  }
 0x12d   : > { %437 = dma.vmem_to_hbm [thread:$0]  (%p949_p12), %s881_s19, 256, %s879_s21, %s293_s28, %s660_s25, %s660_s25, %s661_s9  }
 0x12e PF: > { %p443_p13 = scmp.ge.s32.totalorder %s653_s15, 2  ;;  %s321_s23 = sand.u32 1, %s641_s12  }
 0x12f   : > { %p950_p7 = scmp.ne.s32.totalorder %s946_s5, 0  ;;  %s322_s30 = scalar_lea.sflag [#allocation4], %s321_s23 }
 0x131   : > { %p440_p4 = pnand %p443_p13, %p950_p7 }
 0x133   : > { %p441_p3 = pneg %p440_p4 }
 0x135   : > { %624 = dma.done.wait (%p441_p3), %s322_s30, 256  }
 0x136   : > { %626 = vsyncadd (%p441_p3), %s322_s30, 4294967040  ;;  %s951_s4 = sld [smem:[#allocation11_spill]]  ;;  %p18_p12 = scmp.ge.s32.totalorder %s715_s18, 5  }
 0x137   : > { %s952_s14 = sld [smem:[#allocation12_spill]]  ;;  %s953_s9 = smov %s633_s10 }
 0x138   : > { %s954_s10 = smov %s637_s11  ;;  %s955_s11 = smov %s766_s3 }
 0x139   : > { %s956_s12 = smov %s645_s13  ;;  %s958_s15 = smov %s715_s18 }
 0x13a   :  { %20 = sbr.rel (!%p18_p12) target bundleno = 11 (0xb), region = 86 }
 0x13c   : > { %s957_s13 = smov %s951_s4 }
 0x13f   :  { %327 = vsyncpa [#allocation3], 1 }
 0x140   :  { %329 = vsyncpa [#allocation3 + $0x1], 1 }
 0x141   :  { %330 = vsyncpa [#allocation6], 1 }
 0x142   :  { %332 = vsyncpa [#allocation6 + $0x1], 1 }
 0x143   :  { %333 = vsyncpa [#allocation4], 1 }
 0x144   :  { %335 = vsyncpa [#allocation4 + $0x1], 1 }

</bundles_post_ra>
